<compile_context>
chip_gen: v7x
topology: tpu7x:2x2x1
jax: 0.10.0
libtpu: 0.0.40
codegen_flags: <defaults>
</compile_context>

<pallas_src>
import functools

import jax
import jax.numpy as jnp
from jax.experimental import pallas as pl
from jax.experimental.pallas import tpu as pltpu


LEAKY_SLOPE = 0.01  # torch.nn.LeakyReLU default negative_slope
_MIB = 1024 * 1024


def _round_up(v, m):
    return -(-v // m) * m


def _block_bytes(rows, cols, dtype):
    """VMEM bytes of a (rows, cols) block rounded to its physical tile:
    lanes padded to 128, sublanes to 8 (f32) / 16 (bf16) / 32 (int8)."""
    itemsize = jnp.dtype(dtype).itemsize
    sublane = 8 * (4 // itemsize)
    return _round_up(rows, sublane) * _round_up(cols, 128) * itemsize


def _vmem_budgets():
    """(chooser_budget, vmem_limit_cap) picked per TPU generation.

    v7x has 64 MiB VMEM per TensorCore -> keep conservative 24/48 MiB numbers;
    v5e/v6e have 128 MiB -> let tiles grow into ~64 MiB and raise the scoped
    limit toward 100 MiB.
    """
    cap = 64 * _MIB  # conservative default == v7x per-TC VMEM
    if hasattr(pltpu, "get_tpu_info"):
        try:
            # Hardware query only; any failure just keeps the safe default.
            cap = int(getattr(pltpu.get_tpu_info(), "vmem_capacity_bytes", cap))
        except Exception:
            pass
    if cap <= 64 * _MIB:
        return 24 * _MIB, 48 * _MIB
    return 64 * _MIB, 100 * _MIB


def _mlp_kernel(x_ref, w1_ref, w2_ref, w3_ref, b_ref, o_ref, *,
                n_hidden, n_labels_pad):
    """Fused 3-layer MLP forward pass for one batch tile.

    Matmuls hit the MXU with f32 accumulation; LeakyReLU / sigmoid run in f32
    on the VPU/EUP.
    """
    mx_dtype = w1_ref.dtype
    # x is DMA'd once as f32 and cast in-register; casting in the wrapper
    # would add an extra full HBM read+write pass over x.
    x = x_ref[...].astype(mx_dtype)

    # Packed biases: row 0 = b1, row 1 = b2, row 2 = b3 (lane-padded, f32).
    b = b_ref[...]
    b1 = b[0:1, :n_hidden]
    b2 = b[1:2, :n_hidden]
    b3 = b[2:3, :n_labels_pad]

    # Layer 1: Linear(F -> N) + LeakyReLU
    h1 = jnp.dot(x, w1_ref[...], preferred_element_type=jnp.float32) + b1
    h1 = jnp.maximum(h1, LEAKY_SLOPE * h1).astype(mx_dtype)

    # Layer 2: Linear(N -> N) + LeakyReLU
    h2 = jnp.dot(h1, w2_ref[...], preferred_element_type=jnp.float32) + b2
    h2 = jnp.maximum(h2, LEAKY_SLOPE * h2).astype(mx_dtype)

    # Layer 3: Linear(N -> L_pad) + Sigmoid. Padded label lanes hold
    # sigmoid(0)=0.5 and are sliced off in the wrapper.
    logits = jnp.dot(h2, w3_ref[...], preferred_element_type=jnp.float32) + b3
    o_ref[...] = jax.nn.sigmoid(logits).astype(o_ref.dtype)


def _choose_batch_tile(B, F, N, L_pad, mx_dtype, out_dtype, weight_bytes, budget):
    """Largest batch tile (multiple of 16, dividing B) whose physical-tile
    rounded, double-buffered VMEM footprint fits `budget`.

    Per-grid-step overhead (~0.35us / ~600 cycles) dominates at tiny per-step
    compute, so bigger tiles / fewer steps win; at large B the tile caps at
    the budget, giving multiple 'parallel' steps for the v7x second TC.
    Multiples of 16 keep bf16 output rows sublane-packed.
    """
    candidates = [t for t in (8192, 4096, 2048, 1024, 512, 256, 128, 64, 32, 16)
                  if t <= B and B % t == 0]

    def fits(t):
        x_io = 2 * _block_bytes(t, F, jnp.float32)    # double-buffered x tile (f32)
        o_io = 2 * _block_bytes(t, L_pad, out_dtype)  # double-buffered output tile
        hmid = 2 * _block_bytes(t, N, jnp.float32)    # f32 h1/h2 temporaries
        xcst = _block_bytes(t, F, mx_dtype)           # in-kernel cast copy of x
        return weight_bytes + x_io + o_io + hmid + xcst <= budget

    for t in candidates:  # largest-first; no ">=2 steps" preference
        if fits(t):
            return t
    return B              # degenerate: whole batch as a single block


def classifier_forward(x, params, *, batch_tile=None, use_bf16=True):
    """Run the fused MLP kernel.

    x: [B, num_features] float32
    params: dict with w1 [F,N], b1 [1,N], w2 [N,N], b2 [1,N], w3 [N,L], b3 [1,L]
    Returns [B, num_labels] probabilities (bf16 when use_bf16 else f32).
    """
    B, F = x.shape
    N = params["w1"].shape[1]
    L = params["w3"].shape[1]
    # Lane-dense output: pad num_labels up to a multiple of 128 so output
    # stores are full-lane vst instead of masked partial stores.
    L_pad = _round_up(L, 128)
    C = max(_round_up(N, 128), L_pad)  # packed-bias lane width

    mx_dtype = jnp.bfloat16 if use_bf16 else jnp.float32
    # bf16 output on the bf16 path halves the HBM writeback of the padded
    # output block; sigmoid outputs in [0,1] lose nothing meaningful.
    out_dtype = jnp.bfloat16 if use_bf16 else jnp.float32

    # Weights are tiny and grid-invariant -> cast/pad them in the wrapper.
    # x deliberately stays f32 (cast inside the kernel).
    w1 = params["w1"].astype(mx_dtype)
    w2 = params["w2"].astype(mx_dtype)
    w3 = params["w3"]
    if L_pad != L:
        w3 = jnp.pad(w3, ((0, 0), (0, L_pad - L)))
    w3 = w3.astype(mx_dtype)
    # TODO(synk): at non-toy hidden sizes also pad N (ideally to 256 on
    # v6e/v7x) so each vmatmul fills the MXU; skipped here since F=N=32.

    # Pack b1/b2/b3 into one lane-padded f32 operand (fewer DMA descriptors /
    # semaphores per grid step than three separate tiny operands).
    b_all = jnp.zeros((3, C), jnp.float32)
    b_all = b_all.at[0, :N].set(params["b1"].reshape(-1).astype(jnp.float32))
    b_all = b_all.at[1, :N].set(params["b2"].reshape(-1).astype(jnp.float32))
    b_all = b_all.at[2, :L].set(params["b3"].reshape(-1).astype(jnp.float32))

    budget, vmem_cap = _vmem_budgets()

    # Physical-tile-rounded accounting (32-wide blocks occupy 128 lanes).
    # Weights are grid-invariant; the pipeline still allocates 2 buffers each,
    # but with an invariant index_map they are only DMA'd once.
    weight_bytes = 2 * (_block_bytes(F, N, mx_dtype)
                        + _block_bytes(N, N, mx_dtype)
                        + _block_bytes(N, L_pad, mx_dtype)
                        + _block_bytes(3, C, jnp.float32))

    if batch_tile is None:
        batch_tile = _choose_batch_tile(B, F, N, L_pad, mx_dtype, out_dtype,
                                        weight_bytes, budget)
    assert B % batch_tile == 0, "batch_tile must divide the batch size"
    assert batch_tile == B or batch_tile % 8 == 0, \
        "batch_tile must be a multiple of 8 or the full batch"

    grid = (B // batch_tile,)

    est = (weight_bytes
           + 2 * _block_bytes(batch_tile, F, jnp.float32)
           + 2 * _block_bytes(batch_tile, L_pad, out_dtype)
           + 2 * _block_bytes(batch_tile, N, jnp.float32)
           + _block_bytes(batch_tile, F, mx_dtype))
    vmem_limit = int(min(max(2 * est, 32 * _MIB), vmem_cap))

    kernel = functools.partial(_mlp_kernel, n_hidden=N, n_labels_pad=L_pad)

    out = pl.pallas_call(
        kernel,
        out_shape=jax.ShapeDtypeStruct((B, L_pad), out_dtype),
        grid_spec=pltpu.PrefetchScalarGridSpec(
            num_scalar_prefetch=0,
            grid=grid,
            in_specs=[
                pl.BlockSpec((batch_tile, F), lambda i: (i, 0)),  # x tile (f32)
                pl.BlockSpec((F, N), lambda i: (0, 0)),           # w1 (grid-invariant)
                pl.BlockSpec((N, N), lambda i: (0, 0)),           # w2
                pl.BlockSpec((N, L_pad), lambda i: (0, 0)),       # w3 (lane-padded)
                pl.BlockSpec((3, C), lambda i: (0, 0)),           # packed biases (f32)
            ],
            out_specs=pl.BlockSpec((batch_tile, L_pad), lambda i: (i, 0)),
        ),
        compiler_params=pltpu.CompilerParams(
            dimension_semantics=("parallel",),
            vmem_limit_bytes=vmem_limit,
        ),
    )(x, w1, w2, w3, b_all)

    return out[:, :L] if L_pad != L else out


def init_params(key, num_features, num_neurons, num_labels):
    """Deterministic synthetic parameters (PyTorch-Linear-like uniform init)."""
    ks = jax.random.split(key, 6)

    def uniform(k, shape, fan_in):
        bound = 1.0 / jnp.sqrt(fan_in)
        return jax.random.uniform(k, shape, jnp.float32, -bound, bound)

    return {
        "w1": uniform(ks[0], (num_features, num_neurons), num_features),
        "b1": uniform(ks[1], (1, num_neurons), num_features),
        "w2": uniform(ks[2], (num_neurons, num_neurons), num_neurons),
        "b2": uniform(ks[3], (1, num_neurons), num_neurons),
        "w3": uniform(ks[4], (num_neurons, num_labels), num_neurons),
        "b3": uniform(ks[5], (1, num_labels), num_neurons),
    }


def _reference_forward(x, p):
    h1 = x @ p["w1"] + p["b1"]
    h1 = jnp.where(h1 >= 0, h1, LEAKY_SLOPE * h1)
    h2 = h1 @ p["w2"] + p["b2"]
    h2 = jnp.where(h2 >= 0, h2, LEAKY_SLOPE * h2)
    return jax.nn.sigmoid(h2 @ p["w3"] + p["b3"])


if __name__ == "__main__":
    # Small shapes consistent with the module's forward: x is [batch, num_features].
    batch, num_features, num_neurons, num_labels = 64, 32, 32, 8

    key = jax.random.PRNGKey(0)
    k_x, k_p = jax.random.split(key)

    x = jax.random.normal(k_x, (batch, num_features), dtype=jnp.float32)
    params = init_params(k_p, num_features, num_neurons, num_labels)

    ref = _reference_forward(x, params)

    # f32 path: exact match against the JAX reference.
    out_f32 = jax.block_until_ready(classifier_forward(x, params, use_bf16=False))
    assert out_f32.shape == (batch, num_labels)
    assert out_f32.dtype == jnp.float32
    assert jnp.allclose(out_f32, ref, atol=1e-5, rtol=1e-5), "f32 mismatch vs reference"

    # bf16 MXU path (default / optimized): looser tolerance for the casts.
    out_bf16 = jax.block_until_ready(classifier_forward(x, params, use_bf16=True))
    assert out_bf16.shape == (batch, num_labels)
    assert jnp.allclose(out_bf16.astype(jnp.float32), ref, atol=2e-2, rtol=2e-2), \
        "bf16 mismatch vs reference"

    print("KERNEL_OK")
</pallas_src>

<mosaic_0001>
module attributes {stable_mosaic.version = 11 : i64} {
  func.func @_mlp_kernel(%arg0: i32, %arg1: memref<64x32xf32, #tpu.memory_space<vmem>>, %arg2: memref<32x32xf32, #tpu.memory_space<vmem>>, %arg3: memref<32x32xf32, #tpu.memory_space<vmem>>, %arg4: memref<32x128xf32, #tpu.memory_space<vmem>>, %arg5: memref<3x128xf32, #tpu.memory_space<vmem>>, %arg6: memref<64x128xf32, #tpu.memory_space<vmem>>) attributes {dimension_semantics = [#tpu.dimension_semantics<parallel>], iteration_bounds = array<i64: 1>, scalar_prefetch = 0 : i64, scratch_operands = 0 : i64, tpu.core_type = #tpu.core_type<tc>, window_params = [{transform_indices = @transform_0, window_bounds = array<i64: 64, 32>}, {pipeline_mode = #tpu.pipeline_mode<synchronous>, transform_indices = @transform_1, window_bounds = array<i64: 32, 32>}, {pipeline_mode = #tpu.pipeline_mode<synchronous>, transform_indices = @transform_2, window_bounds = array<i64: 32, 32>}, {pipeline_mode = #tpu.pipeline_mode<synchronous>, transform_indices = @transform_3, window_bounds = array<i64: 32, 128>}, {pipeline_mode = #tpu.pipeline_mode<synchronous>, transform_indices = @transform_4, window_bounds = array<i64: 3, 128>}, {transform_indices = @transform_5, window_bounds = array<i64: 64, 128>}]} {
    %c0 = arith.constant 0 : index
    %c0_0 = arith.constant 0 : index
    %0 = vector.load %arg1[%c0, %c0_0] : memref<64x32xf32, #tpu.memory_space<vmem>>, vector<64x32xf32>
    %c0_1 = arith.constant 0 : index
    %c0_2 = arith.constant 0 : index
    %1 = vector.load %arg5[%c0_1, %c0_2] : memref<3x128xf32, #tpu.memory_space<vmem>>, vector<3x128xf32>
    %2 = vector.extract_strided_slice %1 {offsets = [0, 0], sizes = [1, 32], strides = [1, 1]} : vector<3x128xf32> to vector<1x32xf32>
    %3 = vector.extract_strided_slice %1 {offsets = [1, 0], sizes = [1, 32], strides = [1, 1]} : vector<3x128xf32> to vector<1x32xf32>
    %4 = vector.extract_strided_slice %1 {offsets = [2, 0], sizes = [1, 128], strides = [1, 1]} : vector<3x128xf32> to vector<1x128xf32>
    %c0_3 = arith.constant 0 : index
    %c0_4 = arith.constant 0 : index
    %5 = vector.load %arg2[%c0_3, %c0_4] : memref<32x32xf32, #tpu.memory_space<vmem>>, vector<32x32xf32>
    %cst = arith.constant dense<0.000000e+00> : vector<64x32xf32>
    %6 = tpu.matmul %0, %5, %cst {dimension_numbers = #tpu.dot_dimension_numbers<[1], [0], [0], [1], [0, 0, 1, 1], [], []>} : vector<64x32xf32>, vector<32x32xf32>, vector<64x32xf32> -> vector<64x32xf32>
    %7 = vector.broadcast %2 : vector<1x32xf32> to vector<64x32xf32>
    %8 = arith.addf %6, %7 : vector<64x32xf32>
    %cst_5 = arith.constant 0.00999999977 : f32
    %9 = vector.broadcast %cst_5 : f32 to vector<64x32xf32>
    %10 = arith.mulf %9, %8 : vector<64x32xf32>
    %11 = arith.maximumf %8, %10 : vector<64x32xf32>
    %c0_6 = arith.constant 0 : index
    %c0_7 = arith.constant 0 : index
    %12 = vector.load %arg3[%c0_6, %c0_7] : memref<32x32xf32, #tpu.memory_space<vmem>>, vector<32x32xf32>
    %cst_8 = arith.constant dense<0.000000e+00> : vector<64x32xf32>
    %13 = tpu.matmul %11, %12, %cst_8 {dimension_numbers = #tpu.dot_dimension_numbers<[1], [0], [0], [1], [0, 0, 1, 1], [], []>} : vector<64x32xf32>, vector<32x32xf32>, vector<64x32xf32> -> vector<64x32xf32>
    %14 = vector.broadcast %3 : vector<1x32xf32> to vector<64x32xf32>
    %15 = arith.addf %13, %14 : vector<64x32xf32>
    %cst_9 = arith.constant 0.00999999977 : f32
    %16 = vector.broadcast %cst_9 : f32 to vector<64x32xf32>
    %17 = arith.mulf %16, %15 : vector<64x32xf32>
    %18 = arith.maximumf %15, %17 : vector<64x32xf32>
    %c0_10 = arith.constant 0 : index
    %c0_11 = arith.constant 0 : index
    %19 = vector.load %arg4[%c0_10, %c0_11] : memref<32x128xf32, #tpu.memory_space<vmem>>, vector<32x128xf32>
    %cst_12 = arith.constant dense<0.000000e+00> : vector<64x128xf32>
    %20 = tpu.matmul %18, %19, %cst_12 {dimension_numbers = #tpu.dot_dimension_numbers<[1], [0], [0], [1], [0, 0, 1, 1], [], []>} : vector<64x32xf32>, vector<32x128xf32>, vector<64x128xf32> -> vector<64x128xf32>
    %21 = vector.broadcast %4 : vector<1x128xf32> to vector<64x128xf32>
    %22 = arith.addf %20, %21 : vector<64x128xf32>
    %23 = arith.negf %22 : vector<64x128xf32>
    %24 = math.exp %23 : vector<64x128xf32>
    %cst_13 = arith.constant 1.000000e+00 : f32
    %25 = vector.broadcast %cst_13 : f32 to vector<64x128xf32>
    %26 = arith.addf %25, %24 : vector<64x128xf32>
    %27 = arith.divf %25, %26 : vector<64x128xf32>
    %c0_14 = arith.constant 0 : index
    %c0_15 = arith.constant 0 : index
    %28 = vector.load %arg6[%c0_14, %c0_15] : memref<64x128xf32, #tpu.memory_space<vmem>>, vector<64x128xf32>
    tpu.vector_store %arg6[%c0_14, %c0_15], %27 {strides = array<i32>} : memref<64x128xf32, #tpu.memory_space<vmem>>, vector<64x128xf32>,
    return
  }
  func.func @transform_0(%arg0: i32) -> (i32, i32) {
    %c0_i32 = arith.constant 0 : i32
    %c0_i32_0 = arith.constant 0 : i32
    return %arg0, %c0_i32 : i32, i32
  }
  func.func @transform_1(%arg0: i32) -> (i32, i32) {
    %c0_i32 = arith.constant 0 : i32
    %c0_i32_0 = arith.constant 0 : i32
    %c0_i32_1 = arith.constant 0 : i32
    return %c0_i32, %c0_i32_0 : i32, i32
  }
  func.func @transform_2(%arg0: i32) -> (i32, i32) {
    %c0_i32 = arith.constant 0 : i32
    %c0_i32_0 = arith.constant 0 : i32
    %c0_i32_1 = arith.constant 0 : i32
    return %c0_i32, %c0_i32_0 : i32, i32
  }
  func.func @transform_3(%arg0: i32) -> (i32, i32) {
    %c0_i32 = arith.constant 0 : i32
    %c0_i32_0 = arith.constant 0 : i32
    %c0_i32_1 = arith.constant 0 : i32
    return %c0_i32, %c0_i32_0 : i32, i32
  }
  func.func @transform_4(%arg0: i32) -> (i32, i32) {
    %c0_i32 = arith.constant 0 : i32
    %c0_i32_0 = arith.constant 0 : i32
    %c0_i32_1 = arith.constant 0 : i32
    return %c0_i32, %c0_i32_0 : i32, i32
  }
  func.func @transform_5(%arg0: i32) -> (i32, i32) {
    %c0_i32 = arith.constant 0 : i32
    %c0_i32_0 = arith.constant 0 : i32
    return %arg0, %c0_i32 : i32, i32
  }
}

</mosaic_0001>

<bundles_post_ra>
// kernel: tpu_custom_call.1
= control target key start
LH: loop header
LB: loop body
LE: loop exit
PB: predicated region body
PF: predicated region fallthrough
CT: control target
= control target key end

     0   :  { %vm38_vm0 = vcmask 261120   ;;  %s903_s0 = inlined_call_operand.vmem [shape: f32[64,32], index: 0, kind: input, shape index: {}]   ;;  %s904_s1 = inlined_call_operand.vmem [shape: f32[32,32], index: 1, kind: input, shape index: {}]   ;;  %s905_s2 = inlined_call_operand.vmem [shape: f32[32,32], index: 2, kind: input, shape index: {}]   ;;  %s906_s3 = inlined_call_operand.vmem [shape: f32[32,128], index: 3, kind: input, shape index: {}]   ;;  %s907_s4 = inlined_call_operand.vmem [shape: f32[3,128], index: 4, kind: input, shape index: {}]   ;;  %s908_s5 = inlined_call_operand.hbm [shape: f32[64,128], index: 5, kind: output, shape index: {}]  }
   0x1   :  { %v30_v0 = vld [vmem:[%s904_s1] sm:$0xff]  ;;  %v31_v1 = vld [vmem:[%s904_s1 + $0x8] sm:$0xff]  ;;  %v32_v2 = vld [vmem:[%s904_s1 + $0x10] sm:$0xff] }
   0x2   :  { %v674_v3 = vpack.c.bf16 %v31_v1, %v30_v0  ;;  %v33_v4 = vld [vmem:[%s904_s1 + $0x18] sm:$0xff]  ;;  %v21_v5 = vld [vmem:[%s903_s0] sm:$0xff] }
   0x3   :  { %v678_v6 = vpack.c.bf16 %v33_v4, %v32_v2  ;;  %622 = vmatprep.mubr.msk.f32.mxu0 %vm38_vm0, %v21_v5  ;;  %v25_v7 = vld [vmem:[%s903_s0 + $0x20] sm:$0xff] }
   0x4   :  { %675 = vmatprep.subr.bf16.mxu0 %v674_v3  ;;  %698 = vmatprep.subr.bf16.mxu1 %v674_v3 }
   0x5   :  { %677 = vmatpush3.bf16.msra.mxu0 %v674_v3  ;;  %700 = vmatpush3.bf16.msra.mxu1 %v674_v3 }
   0x6   :  { %10 = vsyncpa [#allocation3], 0  ;;  %679 = vmatprep.subr.bf16.mxu0 %v678_v6  ;;  %699 = vmatprep.subr.bf16.mxu1 %v678_v6  ;;  %v22_v8 = vld [vmem:[%s903_s0 + $0x8] sm:$0xff]  ;;  %v23_v10 = vld [vmem:[%s903_s0 + $0x10] sm:$0xff]  ;;  %v34_v20 = vlaneseq }
   0x7   :  { %628 = vmatprep.mubr.msk.f32.mxu1 %vm38_vm0, %v25_v7  ;;  %v26_v9 = vld [vmem:[%s903_s0 + $0x28] sm:$0xff]  ;;  %v27_v11 = vld [vmem:[%s903_s0 + $0x30] sm:$0xff]  ;;  %v24_v12 = vld [vmem:[%s903_s0 + $0x18] sm:$0xff] }
   0x8   :  { %v28_v13 = vld [vmem:[%s903_s0 + $0x38] sm:$0xff]  ;;  %v184_v14 = vld [vmem:[%s905_s2] sm:$0xff]  ;;  %v185_v15 = vld [vmem:[%s905_s2 + $0x8] sm:$0xff]  ;;  %v850_v21 = vshrl.u32 %v34_v20, 7 }
   0x9   :  { %681 = vmatpush3.bf16.msra.mxu0 %v678_v6  ;;  %701 = vmatpush3.bf16.msra.mxu1 %v678_v6  ;;  %v682_v16 = vpack.c.bf16 %v185_v15, %v184_v14  ;;  %v186_v17 = vld [vmem:[%s905_s2 + $0x10] sm:$0xff]  ;;  %v187_v18 = vld [vmem:[%s905_s2 + $0x18] sm:$0xff]  ;;  %v856_v23 = vld [vmem:[%s907_s4] sm:$0x7] }
   0xa   :  { %v686_v19 = vpack.c.bf16 %v187_v18, %v186_v17  ;;  %v36_v22 = vsub.s32 0, %v850_v21  ;;  %v337_v57 = vld [vmem:[%s906_s3] sm:$0xff]  ;;  %v338_v58 = vld [vmem:[%s906_s3 + $0x8] sm:$0xff]  ;;  %v339_v60 = vld [vmem:[%s906_s3 + $0x10] sm:$0xff]  ;;  %v190_v63 = vsub.s32 1, %v850_v21 }
   0xb   :  { %683 = vmatprep.subr.bf16.mxu1 %v682_v16  ;;  %v690_v59 = vpack.c.bf16 %v338_v58, %v337_v57  ;;  %v340_v61 = vld [vmem:[%s906_s3 + $0x18] sm:$0xff]  ;;  %s761_s3 = smov [#allocation2]  }
   0xc   :  { %623 = vmatmul.mubr.msk.f32.vlgmr.msra.gmra.mrb[0].mxu0 %vm38_vm0, %v22_v8  ;;  %629 = vmatmul.mubr.msk.f32.vlgmr.msra.gmra.mrb[0].mxu1 %vm38_vm0, %v26_v9  ;;  %v37_v24 = vrot.slane %v856_v23, %v36_v22  ;;  %v694_v62 = vpack.c.bf16 %v340_v61, %v339_v60  ;;  %v191_v0 = vrot.slane %v856_v23, %v190_v63  ;;  %s535_s30 = sshll.u32 %s761_s3, 4  ;;  %s536_s30 = int_to_ptr.vmem [resolvable:$true] %s535_s30 }
   0xd   :  { %625 = vmatprep.mubr.msk.f32.mxu0 %vm38_vm0, %v23_v10  ;;  %631 = vmatprep.mubr.msk.f32.mxu1 %vm38_vm0, %v27_v11  ;;  %s737_s6 = scalar_lea.vmem %s536_s30, 1024  ;;  %p742_p1 = scmp.lt.s32.totalorder %s536_s30, %s536_s30 }
   0xe   :  { %685 = vmatpush3.bf16.msra.mxu1 %v682_v16  ;;  %691 = vmatprep.subr.bf16.mxu0 %v690_v59  ;;  %p738_p0 = scmp.ne.s32.totalorder %s536_s30, %s737_s6  ;;  %p743_p2 = scmp.lt.s32.totalorder %s737_s6, %s737_s6 }
   0xf   :  { %687 = vmatprep.subr.bf16.mxu1 %v686_v19  ;;  %693 = vmatpush3.bf16.msra.mxu0 %v690_v59 }
  0x10   :  { %626 = vmatmul.mubr.msk.f32.gmra.mrb[2].mxu0 %vm38_vm0, %v24_v12  ;;  %632 = vmatmul.mubr.msk.f32.gmra.mrb[2].mxu1 %vm38_vm0, %v28_v13  ;;  %p744_p3 = por %p743_p2, %p742_p1 }
  0x11   :  { %695 = vmatprep.subr.bf16.mxu0 %v694_v62 }
  0x12   :  { %689 = vmatpush3.bf16.msra.mxu1 %v686_v19  ;;  %p745_p4 = pnand %p744_p3, %p738_p0 }
  0x13   :  { %697 = vmatpush3.bf16.msra.mxu0 %v694_v62 }
  0xdf   :  { %v624_v25 = vpop.f32.mrb[0].mxu0  ;;  %v630_v26 = vpop.f32.mrb[0].mxu1 }
  0xe0   :  { %v135_v27 = vadd.f32 %v624_v25, %v37_v24  ;;  %v129_v28 = vpop.f32.mrb[1].mxu0  ;;  %v149_v29 = vpop.f32.mrb[1].mxu1  ;;  %v155_v45 = vadd.f32 %v630_v26, %v37_v24 }
  0xe1   :  { %v130_v30 = vadd.f32 %v129_v28, %v37_v24  ;;  %v150_v31 = vadd.f32 %v149_v29, %v37_v24 }
  0xe2   :  { %v169_v32 = vmul.f32 0.01, %v135_v27  ;;  %v173_v51 = vmul.f32 0.01, %v155_v45 }
  0xe3   :  { %v168_v33 = vmul.f32 0.01, %v130_v30  ;;  %v627_v34 = vpop.f32.mrb[2].mxu0  ;;  %v633_v35 = vpop.f32.mrb[2].mxu1  ;;  %v172_v41 = vmul.f32 0.01, %v150_v31 }
  0xe4   :  { %v145_v36 = vadd.f32 %v627_v34, %v37_v24  ;;  %v139_v37 = vpop.f32.mrb[3].mxu0  ;;  %v159_v38 = vpop.f32.mrb[3].mxu1  ;;  %v177_v43 = vmax.f32 %v135_v27, %v169_v32  ;;  %v165_v52 = vadd.f32 %v633_v35, %v37_v24  ;;  %v181_v54 = vmax.f32 %v155_v45, %v173_v51 }
  0xe5   :  { %v176_v39 = vmax.f32 %v130_v30, %v168_v33  ;;  %v140_v40 = vadd.f32 %v139_v37, %v37_v24  ;;  %v160_v42 = vadd.f32 %v159_v38, %v37_v24  ;;  %v180_v48 = vmax.f32 %v150_v31, %v172_v41 }
  0xe6   :  { %v171_v44 = vmul.f32 0.01, %v145_v36  ;;  %v175_v55 = vmul.f32 0.01, %v165_v52  ;;  %v343_v35 = vsub.s32 2, %v850_v21 }
  0xe7   :  { %v170_v46 = vmul.f32 0.01, %v140_v40  ;;  %642 = vmatprep.mubr.msk.f32.mxu1 %vm38_vm0, %v176_v39  ;;  %v174_v49 = vmul.f32 0.01, %v160_v42 }
  0xe8   :  { %643 = vmatmul.mubr.msk.f32.vlgmr.msra.gmra.mrb[4].mxu1 %vm38_vm0, %v177_v43  ;;  %v179_v50 = vmax.f32 %v145_v36, %v171_v44  ;;  %v183_v56 = vmax.f32 %v165_v52, %v175_v55  ;;  %v344_v36 = vrot.slane %v856_v23, %v343_v35 }
  0xe9   :  { %v178_v47 = vmax.f32 %v140_v40, %v170_v46  ;;  %v182_v53 = vmax.f32 %v160_v42, %v174_v49 }
  0xeb   :  { %645 = vmatprep.mubr.msk.f32.mxu1 %vm38_vm0, %v178_v47 }
  0xec   :  { %646 = vmatmul.mubr.msk.f32.gmra.mrb[6].mxu1 %vm38_vm0, %v179_v50 }
  0xed   :  { %648 = vmatprep.mubr.msk.f32.mxu1 %vm38_vm0, %v180_v48 }
  0xf0   :  { %649 = vmatmul.mubr.msk.f32.gmra.mrb[8].mxu1 %vm38_vm0, %v181_v54 }
  0xf1   :  { %651 = vmatprep.mubr.msk.f32.mxu1 %vm38_vm0, %v182_v53 }
  0xf4   :  { %652 = vmatmul.mubr.msk.f32.gmra.mrb[10].mxu1 %vm38_vm0, %v183_v56 }
 0x1bb   :  { %v644_v1 = vpop.f32.mrb[4].mxu1 }
 0x1bc   :  { %v288_v2 = vadd.f32 %v644_v1, %v191_v0  ;;  %v282_v3 = vpop.f32.mrb[5].mxu1 }
 0x1bd   :  { %v283_v4 = vadd.f32 %v282_v3, %v191_v0 }
 0x1be   :  { %v322_v5 = vmul.f32 0.01, %v288_v2 }
 0x1bf   :  { %v321_v6 = vmul.f32 0.01, %v283_v4  ;;  %v647_v7 = vpop.f32.mrb[6].mxu1 }
 0x1c0   :  { %v298_v8 = vadd.f32 %v647_v7, %v191_v0  ;;  %v292_v9 = vpop.f32.mrb[7].mxu1  ;;  %v330_v12 = vmax.f32 %v288_v2, %v322_v5 }
 0x1c1   :  { %v329_v10 = vmax.f32 %v283_v4, %v321_v6  ;;  %v293_v11 = vadd.f32 %v292_v9, %v191_v0 }
 0x1c2   :  { %v324_v13 = vmul.f32 0.01, %v298_v8 }
 0x1c3   :  { %v323_v14 = vmul.f32 0.01, %v293_v11  ;;  %v650_v15 = vpop.f32.mrb[8].mxu1  ;;  %662 = vmatprep.mubr.msk.f32.mxu0 %vm38_vm0, %v329_v10 }
 0x1c4   :  { %v308_v16 = vadd.f32 %v650_v15, %v191_v0  ;;  %v302_v17 = vpop.f32.mrb[9].mxu1  ;;  %663 = vmatmul.mubr.msk.f32.vlgmr.msra.gmra.mrb[4].mxu0 %vm38_vm0, %v330_v12  ;;  %v332_v20 = vmax.f32 %v298_v8, %v324_v13 }
 0x1c5   :  { %v331_v18 = vmax.f32 %v293_v11, %v323_v14  ;;  %v303_v19 = vadd.f32 %v302_v17, %v191_v0 }
 0x1c6   :  { %v326_v22 = vmul.f32 0.01, %v308_v16 }
 0x1c7   :  { %v325_v24 = vmul.f32 0.01, %v303_v19  ;;  %v653_v25 = vpop.f32.mrb[10].mxu1  ;;  %665 = vmatprep.mubr.msk.f32.mxu0 %vm38_vm0, %v331_v18 }
 0x1c8   :  { %v318_v26 = vadd.f32 %v653_v25, %v191_v0  ;;  %v312_v27 = vpop.f32.mrb[11].mxu1  ;;  %666 = vmatmul.mubr.msk.f32.gmra.mrb[6].mxu0 %vm38_vm0, %v332_v20  ;;  %v334_v30 = vmax.f32 %v308_v16, %v326_v22 }
 0x1c9   :  { %v333_v28 = vmax.f32 %v303_v19, %v325_v24  ;;  %v313_v29 = vadd.f32 %v312_v27, %v191_v0 }
 0x1ca   :  { %v328_v31 = vmul.f32 0.01, %v318_v26 }
 0x1cb   :  { %v327_v32 = vmul.f32 0.01, %v313_v29  ;;  %668 = vmatprep.mubr.msk.f32.mxu0 %vm38_vm0, %v333_v28 }
 0x1cc   :  { %669 = vmatmul.mubr.msk.f32.gmra.mrb[8].mxu0 %vm38_vm0, %v334_v30  ;;  %v336_v34 = vmax.f32 %v318_v26, %v328_v31 }
 0x1cd   :  { %v335_v33 = vmax.f32 %v313_v29, %v327_v32 }
 0x1cf   :  { %671 = vmatprep.mubr.msk.f32.mxu0 %vm38_vm0, %v335_v33 }
 0x1d0   :  { %672 = vmatmul.mubr.msk.f32.gmra.mrb[10].mxu0 %vm38_vm0, %v336_v34 }
 0x297   :  { %v664_v37 = vpop.f32.mrb[4].mxu0 }
 0x298   :  { %v441_v38 = vadd.f32 %v664_v37, %v344_v36  ;;  %v435_v39 = vpop.f32.mrb[5].mxu0 }
 0x299   :  { %v436_v40 = vadd.f32 %v435_v39, %v344_v36 }
 0x29a   :  { %v571_v41 = vmul.f32 -1.442695, %v441_v38 }
 0x29b   :  { %v570_v42 = vmul.f32 -1.442695, %v436_v40  ;;  %v667_v43 = vpop.f32.mrb[6].mxu0 }
 0x29c   :  { %705 = vpow2.f32 %v571_v41  ;;  %v451_v44 = vadd.f32 %v667_v43, %v344_v36  ;;  %v445_v45 = vpop.f32.mrb[7].mxu0 }
 0x29d   :  { %707 = vpow2.f32 %v570_v42  ;;  %v446_v46 = vadd.f32 %v445_v45, %v344_v36 }
 0x29e   :  { %v573_v47 = vmul.f32 -1.442695, %v451_v44 }
 0x29f   :  { %v572_v48 = vmul.f32 -1.442695, %v446_v46  ;;  %v670_v49 = vpop.f32.mrb[8].mxu0 }
 0x2a0   :  { %709 = vpow2.f32 %v573_v47  ;;  %v461_v50 = vadd.f32 %v670_v49, %v344_v36  ;;  %v455_v21 = vpop.f32.mrb[9].mxu0 }
 0x2a1   :  { %711 = vpow2.f32 %v572_v48  ;;  %v456_v23 = vadd.f32 %v455_v21, %v344_v36 }
 0x2a2   :  { %v575_v51 = vmul.f32 -1.442695, %v461_v50 }
 0x2a3   :  { %v574_v52 = vmul.f32 -1.442695, %v456_v23  ;;  %v673_v53 = vpop.f32.mrb[10].mxu0 }
 0x2a4   :  { %713 = vpow2.f32 %v575_v51  ;;  %v471_v54 = vadd.f32 %v673_v53, %v344_v36  ;;  %v465_v55 = vpop.f32.mrb[11].mxu0 }
 0x2a5   :  { %715 = vpow2.f32 %v574_v52  ;;  %v466_v56 = vadd.f32 %v465_v55, %v344_v36 }
 0x2a6   :  { %v706_v57 = vpop.eup %705  ;;  %v577_v58 = vmul.f32 -1.442695, %v471_v54 }
 0x2a7   :  { %v708_v59 = vpop.eup %707  ;;  %v499_v60 = vadd.f32 1.0, %v706_v57  ;;  %v576_v61 = vmul.f32 -1.442695, %v466_v56 }
 0x2a8   :  { %v498_v62 = vadd.f32 1.0, %v708_v59  ;;  %717 = vpow2.f32 %v577_v58 }
 0x2a9   :  { %719 = vrcp.f32 %v499_v60 }
 0x2aa   :  { %v710_v63 = vpop.eup %709  ;;  %721 = vrcp.f32 %v498_v62 }
 0x2ab   :  { %v712_v0 = vpop.eup %711  ;;  %v501_v1 = vadd.f32 1.0, %v710_v63  ;;  %723 = vpow2.f32 %v576_v61 }
 0x2ac   :  { %v500_v2 = vadd.f32 1.0, %v712_v0 }
 0x2ad   :  { %725 = vrcp.f32 %v501_v1 }
 0x2ae   :  { %v714_v3 = vpop.eup %713  ;;  %727 = vrcp.f32 %v500_v2 }
 0x2af   :  { %v716_v4 = vpop.eup %715  ;;  %v503_v5 = vadd.f32 1.0, %v714_v3 }
 0x2b0   :  { %v502_v6 = vadd.f32 1.0, %v716_v4 }
 0x2b1   :  { %729 = vrcp.f32 %v503_v5 }
 0x2b2   :  { %v718_v7 = vpop.eup %717  ;;  %731 = vrcp.f32 %v502_v6 }
 0x2b3   :  { %v720_v8 = vpop.eup %719  ;;  %v505_v9 = vadd.f32 1.0, %v718_v7 }
 0x2b4   :  { %v722_v10 = vpop.eup %721  ;;  %523 = vst [vmem:[#allocation2 + $0x8] sm:$0xff] %v720_v8 }
 0x2b5   :  { %v724_v11 = vpop.eup %723  ;;  %522 = vst [vmem:[#allocation2] sm:$0xff] %v722_v10  ;;  %733 = vrcp.f32 %v505_v9 }
 0x2b6   :  { %v504_v12 = vadd.f32 1.0, %v724_v11 }
 0x2b7   :  { %v726_v13 = vpop.eup %725 }
 0x2b8   :  { %v728_v14 = vpop.eup %727  ;;  %525 = vst [vmem:[#allocation2 + $0x18] sm:$0xff] %v726_v13  ;;  %735 = vrcp.f32 %v504_v12 }
 0x2b9   :  { %524 = vst [vmem:[#allocation2 + $0x10] sm:$0xff] %v728_v14 }
 0x2bb   :  { %v730_v15 = vpop.eup %729 }
 0x2bc   :  { %v732_v16 = vpop.eup %731  ;;  %527 = vst [vmem:[#allocation2 + $0x28] sm:$0xff] %v730_v15 }
 0x2bd   :  { %526 = vst [vmem:[#allocation2 + $0x20] sm:$0xff] %v732_v16 }
 0x2bf   :  { %v734_v17 = vpop.eup %733 }
 0x2c0   :  { %529 = vst [vmem:[#allocation2 + $0x38] sm:$0xff] %v734_v17 }
 0x2c2   :  { %v736_v18 = vpop.eup %735 }
 0x2c3   :  { %528 = vst [vmem:[#allocation2 + $0x30] sm:$0xff] %v736_v18 }
 0x2c4   :  { %748 = shalt.err (!%p745_p4)
}
 0x2c5   :  { %s749_s9 = scalar_lea.hbm %s908_s5, 1024 }
 0x2c6   :  { %p750_p5 = scmp.ne.s32.totalorder %s908_s5, %s749_s9  ;;  %p753_p6 = scmp.lt.u32.totalorder %s749_s9, %s908_s5 }
 0x2c8   :  { %p755_p7 = pnand %p753_p6, %p750_p5 }
 0x2ca   :  { %758 = shalt.err (!%p755_p7)
}
 0x2cb   :  { %s762_s14 = smov 128   ;;  %s763_s15 = smov 8  }
 0x2cc   :  { %541 = dma.vmem_to_hbm [thread:$0]  %s536_s30, 1024, %s908_s5, [#allocation3], %s762_s14, %s762_s14, %s763_s15  }
 0x2cd   :  { %759 = dma.done.wait [#allocation3], 1024  }
 0x2ce   :  { %760 = vsyncadd [#allocation3], 4294966272 }
 0x2cf   :  { %545 = vsyncpa [#allocation3], 1 }

</bundles_post_ra>
